<compile_context>
chip_gen: v6e
topology: v6e:2x2x1
jax: 0.10.0
libtpu: 0.0.40
codegen_flags: <defaults>
</compile_context>

<pallas_src>
import functools

import jax
import jax.numpy as jnp
import numpy as np
from jax import lax
from jax.experimental import pallas as pl
from jax.experimental.pallas import tpu as pltpu


def lstm_kernel(gx_ref, wh_ref, out_ref, c_out_ref, h_scr, c_scr):
    """One grid step = TT timesteps of the recurrence.

    gx_ref : (TT, B, 4H)  precomputed x @ W_x + b for this time block
    wh_ref : (H, 4H)      recurrent weights, resident in VMEM
    out_ref: (TT, B, H)   hidden states for this time block
    c_out_ref: (B, H)     final cell state (written on last grid step only)
    h_scr, c_scr: (B, H)  recurrent carries (persist across grid steps)
    """
    tb = pl.program_id(0)

    # Zero-initialize the recurrent state on the first time block.
    @pl.when(tb == 0)
    def _():
        h_scr[...] = jnp.zeros_like(h_scr)
        c_scr[...] = jnp.zeros_like(c_scr)

    nh = h_scr.shape[-1]
    tt = gx_ref.shape[0]
    wh = wh_ref[...]  # load once; stays in vregs/VMEM across the unrolled loop

    def step(t, carry):
        h = h_scr[...]
        c = c_scr[...]
        # Single (B, H) x (H, 4H) MXU matmul per timestep; x-projection and
        # bias were hoisted out of the serial loop.
        gates = gx_ref[t] + jnp.dot(h, wh, preferred_element_type=jnp.float32)

        # Gate order along the 4H axis: [i, f, o, c], matching the wrapper.
        # TODO(synk): for production sizes keep H a multiple of 128 (or use a
        # (B, 4, H) gate layout) so these lane slices are whole vreg tiles.
        i_g = jax.nn.sigmoid(gates[:, 0 * nh:1 * nh])
        f_g = jax.nn.sigmoid(gates[:, 1 * nh:2 * nh])
        o_g = jax.nn.sigmoid(gates[:, 2 * nh:3 * nh])
        c_til = jnp.tanh(gates[:, 3 * nh:4 * nh])

        c_new = f_g * c + i_g * c_til
        h_new = o_g * jnp.tanh(c_new)

        c_scr[...] = c_new
        h_scr[...] = h_new
        out_ref[t] = h_new.astype(out_ref.dtype)
        return carry

    # Fully unrolled time loop inside the block (static trip count).
    lax.fori_loop(0, tt, step, 0, unroll=True)

    # Final cell state: the constant index_map keeps this block resident, so a
    # single write on the last time block is sufficient.
    @pl.when(tb == pl.num_programs(0) - 1)
    def _():
        c_out_ref[...] = c_scr[...].astype(c_out_ref.dtype)


@functools.partial(jax.jit, static_argnames=("time_block",))
def lstm_forward(inputs, W_x, W_h, b, *, time_block=None):
    """inputs: (T, B, D); W_x: (D, 4H); W_h: (H, 4H); b: (1, 4H)."""
    T, B, D = inputs.shape
    H4 = W_h.shape[1]
    H = H4 // 4

    # Hoist the input projection + bias out of the serial recurrence: it has
    # no time dependency, so it runs as one large XLA matmul (MXU-friendly).
    gx = (jnp.einsum("tbd,dg->tbg", inputs.astype(jnp.float32),
                     W_x.astype(jnp.float32)) + b).astype(jnp.float32)

    # Choose a time block that divides T (toy T=8 -> single grid step).
    if time_block is None or T % time_block != 0:
        time_block = T
    TT = time_block

    outs, c_final = pl.pallas_call(
        lstm_kernel,
        out_shape=(
            jax.ShapeDtypeStruct((T, B, H), jnp.float32),
            jax.ShapeDtypeStruct((B, H), jnp.float32),
        ),
        grid_spec=pltpu.PrefetchScalarGridSpec(
            num_scalar_prefetch=0,
            grid=(T // TT,),
            in_specs=[
                pl.BlockSpec((TT, B, H4), lambda t: (t, 0, 0)),  # gx block
                pl.BlockSpec((H, H4), lambda t: (0, 0)),         # W_h resident
            ],
            out_specs=[
                pl.BlockSpec((TT, B, H), lambda t: (t, 0, 0)),   # hidden states
                pl.BlockSpec((B, H), lambda t: (0, 0)),          # final cell
            ],
            scratch_shapes=[
                pltpu.VMEM((B, H), jnp.float32),  # h carry
                pltpu.VMEM((B, H), jnp.float32),  # c carry
            ],
        ),
        compiler_params=pltpu.CompilerParams(
            # Time blocks are a sequential recurrence -> "arbitrary".
            dimension_semantics=("arbitrary",),
        ),
    )(gx, W_h)

    h_final = outs[-1]
    return outs, (h_final, c_final)


def _orthogonal(key, shape):
    # Deterministic orthogonal init (matches nn.init.orthogonal_ semantics).
    return jax.nn.initializers.orthogonal()(key, shape, jnp.float32)


def lstm_reference(inputs, W_x, W_h, b):
    T, B, D = inputs.shape
    H = W_h.shape[0]
    h = jnp.zeros((B, H), jnp.float32)
    c = jnp.zeros((B, H), jnp.float32)
    outs = []
    for t in range(T):
        g = inputs[t] @ W_x + h @ W_h + b
        i = jax.nn.sigmoid(g[:, 0 * H:1 * H])
        f = jax.nn.sigmoid(g[:, 1 * H:2 * H])
        o = jax.nn.sigmoid(g[:, 2 * H:3 * H])
        ct = jnp.tanh(g[:, 3 * H:4 * H])
        c = f * c + i * ct
        h = o * jnp.tanh(c)
        outs.append(h)
    return jnp.stack(outs), (h, c)


if __name__ == "__main__":
    seq_len, batch, num_inputs, num_hiddens = 8, 2, 4, 32

    key = jax.random.PRNGKey(0)
    keys = jax.random.split(key, 13)

    # Parameters (gate order along the 4H axis: [i, f, o, c])
    W_xi = _orthogonal(keys[0], (num_inputs, num_hiddens))
    W_xf = _orthogonal(keys[1], (num_inputs, num_hiddens))
    W_xo = _orthogonal(keys[2], (num_inputs, num_hiddens))
    W_xc = _orthogonal(keys[3], (num_inputs, num_hiddens))
    W_hi = _orthogonal(keys[4], (num_hiddens, num_hiddens))
    W_hf = _orthogonal(keys[5], (num_hiddens, num_hiddens))
    W_ho = _orthogonal(keys[6], (num_hiddens, num_hiddens))
    W_hc = _orthogonal(keys[7], (num_hiddens, num_hiddens))
    b_i = jax.random.normal(keys[8], (num_hiddens,), jnp.float32)
    b_f = jax.random.normal(keys[9], (num_hiddens,), jnp.float32)
    b_o = jax.random.normal(keys[10], (num_hiddens,), jnp.float32)
    b_c = jax.random.normal(keys[11], (num_hiddens,), jnp.float32)

    W_x = jnp.concatenate([W_xi, W_xf, W_xo, W_xc], axis=1)        # (D, 4H)
    W_h = jnp.concatenate([W_hi, W_hf, W_ho, W_hc], axis=1)        # (H, 4H)
    b = jnp.concatenate([b_i, b_f, b_o, b_c])[None, :]             # (1, 4H)

    inputs = jax.random.normal(keys[12], (seq_len, batch, num_inputs), jnp.float32)

    outs, (h_final, c_final) = lstm_forward(inputs, W_x, W_h, b)
    jax.block_until_ready((outs, h_final, c_final))

    ref_outs, (ref_h, ref_c) = lstm_reference(inputs, W_x, W_h, b)
    assert np.allclose(np.asarray(outs), np.asarray(ref_outs), atol=1e-5)
    assert np.allclose(np.asarray(h_final), np.asarray(ref_h), atol=1e-5)
    assert np.allclose(np.asarray(c_final), np.asarray(ref_c), atol=1e-5)

    print("KERNEL_OK")
</pallas_src>

<mosaic_0001>
module attributes {stable_mosaic.version = 11 : i64} {
  func.func @lstm_kernel(%arg0: i32, %arg1: memref<8x2x128xf32, #tpu.memory_space<vmem>>, %arg2: memref<32x128xf32, #tpu.memory_space<vmem>>, %arg3: memref<8x2x32xf32, #tpu.memory_space<vmem>>, %arg4: memref<2x32xf32, #tpu.memory_space<vmem>>, %arg5: memref<2x32xf32, #tpu.memory_space<vmem>>, %arg6: memref<2x32xf32, #tpu.memory_space<vmem>>) attributes {dimension_semantics = [#tpu.dimension_semantics<arbitrary>], iteration_bounds = array<i64: 1>, scalar_prefetch = 0 : i64, scratch_operands = 2 : i64, tpu.core_type = #tpu.core_type<tc>, window_params = [{transform_indices = @transform_0, window_bounds = array<i64: 8, 2, 128>}, {pipeline_mode = #tpu.pipeline_mode<synchronous>, transform_indices = @transform_1, window_bounds = array<i64: 32, 128>}, {transform_indices = @transform_2, window_bounds = array<i64: 8, 2, 32>}, {pipeline_mode = #tpu.pipeline_mode<synchronous>, transform_indices = @transform_3, window_bounds = array<i64: 2, 32>}]} {
    %c0_i32 = arith.constant 0 : i32
    %0 = arith.cmpi eq, %arg0, %c0_i32 : i32
    %1 = arith.extui %0 : i1 to i32
    %c0_i32_0 = arith.constant 0 : i32
    %2 = arith.cmpi ne, %1, %c0_i32_0 : i32
    scf.if %2 {
      %cst_132 = arith.constant 0.000000e+00 : f32
      %311 = vector.broadcast %cst_132 : f32 to vector<2x32xf32>
      %c0_133 = arith.constant 0 : index
      %c0_134 = arith.constant 0 : index
      %312 = vector.load %arg5[%c0_133, %c0_134] : memref<2x32xf32, #tpu.memory_space<vmem>>, vector<2x32xf32>
      tpu.vector_store %arg5[%c0_133, %c0_134], %311 {strides = array<i32>} : memref<2x32xf32, #tpu.memory_space<vmem>>, vector<2x32xf32>,
      %cst_135 = arith.constant 0.000000e+00 : f32
      %313 = vector.broadcast %cst_135 : f32 to vector<2x32xf32>
      %c0_136 = arith.constant 0 : index
      %c0_137 = arith.constant 0 : index
      %314 = vector.load %arg6[%c0_136, %c0_137] : memref<2x32xf32, #tpu.memory_space<vmem>>, vector<2x32xf32>
      tpu.vector_store %arg6[%c0_136, %c0_137], %313 {strides = array<i32>} : memref<2x32xf32, #tpu.memory_space<vmem>>, vector<2x32xf32>,
    } else {
    }
    %c0 = arith.constant 0 : index
    %c0_1 = arith.constant 0 : index
    %3 = vector.load %arg2[%c0, %c0_1] : memref<32x128xf32, #tpu.memory_space<vmem>>, vector<32x128xf32>
    %c0_i32_2 = arith.constant 0 : i32
    %c0_3 = arith.constant 0 : index
    %c0_4 = arith.constant 0 : index
    %4 = vector.load %arg5[%c0_3, %c0_4] : memref<2x32xf32, #tpu.memory_space<vmem>>, vector<2x32xf32>
    %c0_5 = arith.constant 0 : index
    %c0_6 = arith.constant 0 : index
    %5 = vector.load %arg6[%c0_5, %c0_6] : memref<2x32xf32, #tpu.memory_space<vmem>>, vector<2x32xf32>
    %6 = arith.index_cast %c0_i32_2 : i32 to index
    %c0_7 = arith.constant 0 : index
    %c0_8 = arith.constant 0 : index
    %7 = vector.load %arg1[%6, %c0_7, %c0_8] : memref<8x2x128xf32, #tpu.memory_space<vmem>>, vector<1x2x128xf32>
    %8 = vector.shape_cast %7 : vector<1x2x128xf32> to vector<2x128xf32>
    %cst = arith.constant dense<0.000000e+00> : vector<2x128xf32>
    %9 = tpu.matmul %4, %3, %cst {dimension_numbers = #tpu.dot_dimension_numbers<[1], [0], [0], [1], [0, 0, 1, 1], [], []>} : vector<2x32xf32>, vector<32x128xf32>, vector<2x128xf32> -> vector<2x128xf32>
    %10 = arith.addf %8, %9 : vector<2x128xf32>
    %11 = vector.extract_strided_slice %10 {offsets = [0, 0], sizes = [2, 32], strides = [1, 1]} : vector<2x128xf32> to vector<2x32xf32>
    %12 = arith.negf %11 : vector<2x32xf32>
    %13 = math.exp %12 : vector<2x32xf32>
    %cst_9 = arith.constant 1.000000e+00 : f32
    %14 = vector.broadcast %cst_9 : f32 to vector<2x32xf32>
    %15 = arith.addf %14, %13 : vector<2x32xf32>
    %16 = arith.divf %14, %15 : vector<2x32xf32>
    %17 = vector.extract_strided_slice %10 {offsets = [0, 32], sizes = [2, 32], strides = [1, 1]} : vector<2x128xf32> to vector<2x32xf32>
    %18 = arith.negf %17 : vector<2x32xf32>
    %19 = math.exp %18 : vector<2x32xf32>
    %cst_10 = arith.constant 1.000000e+00 : f32
    %20 = vector.broadcast %cst_10 : f32 to vector<2x32xf32>
    %21 = arith.addf %20, %19 : vector<2x32xf32>
    %22 = arith.divf %20, %21 : vector<2x32xf32>
    %23 = vector.extract_strided_slice %10 {offsets = [0, 64], sizes = [2, 32], strides = [1, 1]} : vector<2x128xf32> to vector<2x32xf32>
    %24 = arith.negf %23 : vector<2x32xf32>
    %25 = math.exp %24 : vector<2x32xf32>
    %cst_11 = arith.constant 1.000000e+00 : f32
    %26 = vector.broadcast %cst_11 : f32 to vector<2x32xf32>
    %27 = arith.addf %26, %25 : vector<2x32xf32>
    %28 = arith.divf %26, %27 : vector<2x32xf32>
    %29 = vector.extract_strided_slice %10 {offsets = [0, 96], sizes = [2, 32], strides = [1, 1]} : vector<2x128xf32> to vector<2x32xf32>
    %30 = math.tanh %29 : vector<2x32xf32>
    %31 = arith.mulf %22, %5 : vector<2x32xf32>
    %32 = arith.mulf %16, %30 : vector<2x32xf32>
    %33 = arith.addf %31, %32 : vector<2x32xf32>
    %34 = math.tanh %33 : vector<2x32xf32>
    %35 = arith.mulf %28, %34 : vector<2x32xf32>
    %c0_12 = arith.constant 0 : index
    %c0_13 = arith.constant 0 : index
    %36 = vector.load %arg6[%c0_12, %c0_13] : memref<2x32xf32, #tpu.memory_space<vmem>>, vector<2x32xf32>
    tpu.vector_store %arg6[%c0_12, %c0_13], %33 {strides = array<i32>} : memref<2x32xf32, #tpu.memory_space<vmem>>, vector<2x32xf32>,
    %c0_14 = arith.constant 0 : index
    %c0_15 = arith.constant 0 : index
    %37 = vector.load %arg5[%c0_14, %c0_15] : memref<2x32xf32, #tpu.memory_space<vmem>>, vector<2x32xf32>
    tpu.vector_store %arg5[%c0_14, %c0_15], %35 {strides = array<i32>} : memref<2x32xf32, #tpu.memory_space<vmem>>, vector<2x32xf32>,
    %38 = arith.index_cast %c0_i32_2 : i32 to index
    %c0_16 = arith.constant 0 : index
    %c0_17 = arith.constant 0 : index
    %39 = vector.load %arg3[%38, %c0_16, %c0_17] : memref<8x2x32xf32, #tpu.memory_space<vmem>>, vector<1x2x32xf32>
    %40 = vector.shape_cast %39 : vector<1x2x32xf32> to vector<2x32xf32>
    %41 = vector.shape_cast %35 : vector<2x32xf32> to vector<1x2x32xf32>
    tpu.vector_store %arg3[%38, %c0_16, %c0_17], %41 {strides = array<i32>} : memref<8x2x32xf32, #tpu.memory_space<vmem>>, vector<1x2x32xf32>,
    %c1_i32 = arith.constant 1 : i32
    %c0_18 = arith.constant 0 : index
    %c0_19 = arith.constant 0 : index
    %42 = vector.load %arg5[%c0_18, %c0_19] : memref<2x32xf32, #tpu.memory_space<vmem>>, vector<2x32xf32>
    %c0_20 = arith.constant 0 : index
    %c0_21 = arith.constant 0 : index
    %43 = vector.load %arg6[%c0_20, %c0_21] : memref<2x32xf32, #tpu.memory_space<vmem>>, vector<2x32xf32>
    %44 = arith.index_cast %c1_i32 : i32 to index
    %c0_22 = arith.constant 0 : index
    %c0_23 = arith.constant 0 : index
    %45 = vector.load %arg1[%44, %c0_22, %c0_23] : memref<8x2x128xf32, #tpu.memory_space<vmem>>, vector<1x2x128xf32>
    %46 = vector.shape_cast %45 : vector<1x2x128xf32> to vector<2x128xf32>
    %cst_24 = arith.constant dense<0.000000e+00> : vector<2x128xf32>
    %47 = tpu.matmul %42, %3, %cst_24 {dimension_numbers = #tpu.dot_dimension_numbers<[1], [0], [0], [1], [0, 0, 1, 1], [], []>} : vector<2x32xf32>, vector<32x128xf32>, vector<2x128xf32> -> vector<2x128xf32>
    %48 = arith.addf %46, %47 : vector<2x128xf32>
    %49 = vector.extract_strided_slice %48 {offsets = [0, 0], sizes = [2, 32], strides = [1, 1]} : vector<2x128xf32> to vector<2x32xf32>
    %50 = arith.negf %49 : vector<2x32xf32>
    %51 = math.exp %50 : vector<2x32xf32>
    %cst_25 = arith.constant 1.000000e+00 : f32
    %52 = vector.broadcast %cst_25 : f32 to vector<2x32xf32>
    %53 = arith.addf %52, %51 : vector<2x32xf32>
    %54 = arith.divf %52, %53 : vector<2x32xf32>
    %55 = vector.extract_strided_slice %48 {offsets = [0, 32], sizes = [2, 32], strides = [1, 1]} : vector<2x128xf32> to vector<2x32xf32>
    %56 = arith.negf %55 : vector<2x32xf32>
    %57 = math.exp %56 : vector<2x32xf32>
    %cst_26 = arith.constant 1.000000e+00 : f32
    %58 = vector.broadcast %cst_26 : f32 to vector<2x32xf32>
    %59 = arith.addf %58, %57 : vector<2x32xf32>
    %60 = arith.divf %58, %59 : vector<2x32xf32>
    %61 = vector.extract_strided_slice %48 {offsets = [0, 64], sizes = [2, 32], strides = [1, 1]} : vector<2x128xf32> to vector<2x32xf32>
    %62 = arith.negf %61 : vector<2x32xf32>
    %63 = math.exp %62 : vector<2x32xf32>
    %cst_27 = arith.constant 1.000000e+00 : f32
    %64 = vector.broadcast %cst_27 : f32 to vector<2x32xf32>
    %65 = arith.addf %64, %63 : vector<2x32xf32>
    %66 = arith.divf %64, %65 : vector<2x32xf32>
    %67 = vector.extract_strided_slice %48 {offsets = [0, 96], sizes = [2, 32], strides = [1, 1]} : vector<2x128xf32> to vector<2x32xf32>
    %68 = math.tanh %67 : vector<2x32xf32>
    %69 = arith.mulf %60, %43 : vector<2x32xf32>
    %70 = arith.mulf %54, %68 : vector<2x32xf32>
    %71 = arith.addf %69, %70 : vector<2x32xf32>
    %72 = math.tanh %71 : vector<2x32xf32>
    %73 = arith.mulf %66, %72 : vector<2x32xf32>
    %c0_28 = arith.constant 0 : index
    %c0_29 = arith.constant 0 : index
    %74 = vector.load %arg6[%c0_28, %c0_29] : memref<2x32xf32, #tpu.memory_space<vmem>>, vector<2x32xf32>
    tpu.vector_store %arg6[%c0_28, %c0_29], %71 {strides = array<i32>} : memref<2x32xf32, #tpu.memory_space<vmem>>, vector<2x32xf32>,
    %c0_30 = arith.constant 0 : index
    %c0_31 = arith.constant 0 : index
    %75 = vector.load %arg5[%c0_30, %c0_31] : memref<2x32xf32, #tpu.memory_space<vmem>>, vector<2x32xf32>
    tpu.vector_store %arg5[%c0_30, %c0_31], %73 {strides = array<i32>} : memref<2x32xf32, #tpu.memory_space<vmem>>, vector<2x32xf32>,
    %76 = arith.index_cast %c1_i32 : i32 to index
    %c0_32 = arith.constant 0 : index
    %c0_33 = arith.constant 0 : index
    %77 = vector.load %arg3[%76, %c0_32, %c0_33] : memref<8x2x32xf32, #tpu.memory_space<vmem>>, vector<1x2x32xf32>
    %78 = vector.shape_cast %77 : vector<1x2x32xf32> to vector<2x32xf32>
    %79 = vector.shape_cast %73 : vector<2x32xf32> to vector<1x2x32xf32>
    tpu.vector_store %arg3[%76, %c0_32, %c0_33], %79 {strides = array<i32>} : memref<8x2x32xf32, #tpu.memory_space<vmem>>, vector<1x2x32xf32>,
    %c2_i32 = arith.constant 2 : i32
    %c0_34 = arith.constant 0 : index
    %c0_35 = arith.constant 0 : index
    %80 = vector.load %arg5[%c0_34, %c0_35] : memref<2x32xf32, #tpu.memory_space<vmem>>, vector<2x32xf32>
    %c0_36 = arith.constant 0 : index
    %c0_37 = arith.constant 0 : index
    %81 = vector.load %arg6[%c0_36, %c0_37] : memref<2x32xf32, #tpu.memory_space<vmem>>, vector<2x32xf32>
    %82 = arith.index_cast %c2_i32 : i32 to index
    %c0_38 = arith.constant 0 : index
    %c0_39 = arith.constant 0 : index
    %83 = vector.load %arg1[%82, %c0_38, %c0_39] : memref<8x2x128xf32, #tpu.memory_space<vmem>>, vector<1x2x128xf32>
    %84 = vector.shape_cast %83 : vector<1x2x128xf32> to vector<2x128xf32>
    %cst_40 = arith.constant dense<0.000000e+00> : vector<2x128xf32>
    %85 = tpu.matmul %80, %3, %cst_40 {dimension_numbers = #tpu.dot_dimension_numbers<[1], [0], [0], [1], [0, 0, 1, 1], [], []>} : vector<2x32xf32>, vector<32x128xf32>, vector<2x128xf32> -> vector<2x128xf32>
    %86 = arith.addf %84, %85 : vector<2x128xf32>
    %87 = vector.extract_strided_slice %86 {offsets = [0, 0], sizes = [2, 32], strides = [1, 1]} : vector<2x128xf32> to vector<2x32xf32>
    %88 = arith.negf %87 : vector<2x32xf32>
    %89 = math.exp %88 : vector<2x32xf32>
    %cst_41 = arith.constant 1.000000e+00 : f32
    %90 = vector.broadcast %cst_41 : f32 to vector<2x32xf32>
    %91 = arith.addf %90, %89 : vector<2x32xf32>
    %92 = arith.divf %90, %91 : vector<2x32xf32>
    %93 = vector.extract_strided_slice %86 {offsets = [0, 32], sizes = [2, 32], strides = [1, 1]} : vector<2x128xf32> to vector<2x32xf32>
    %94 = arith.negf %93 : vector<2x32xf32>
    %95 = math.exp %94 : vector<2x32xf32>
    %cst_42 = arith.constant 1.000000e+00 : f32
    %96 = vector.broadcast %cst_42 : f32 to vector<2x32xf32>
    %97 = arith.addf %96, %95 : vector<2x32xf32>
    %98 = arith.divf %96, %97 : vector<2x32xf32>
    %99 = vector.extract_strided_slice %86 {offsets = [0, 64], sizes = [2, 32], strides = [1, 1]} : vector<2x128xf32> to vector<2x32xf32>
    %100 = arith.negf %99 : vector<2x32xf32>
    %101 = math.exp %100 : vector<2x32xf32>
    %cst_43 = arith.constant 1.000000e+00 : f32
    %102 = vector.broadcast %cst_43 : f32 to vector<2x32xf32>
    %103 = arith.addf %102, %101 : vector<2x32xf32>
    %104 = arith.divf %102, %103 : vector<2x32xf32>
    %105 = vector.extract_strided_slice %86 {offsets = [0, 96], sizes = [2, 32], strides = [1, 1]} : vector<2x128xf32> to vector<2x32xf32>
    %106 = math.tanh %105 : vector<2x32xf32>
    %107 = arith.mulf %98, %81 : vector<2x32xf32>
    %108 = arith.mulf %92, %106 : vector<2x32xf32>
    %109 = arith.addf %107, %108 : vector<2x32xf32>
    %110 = math.tanh %109 : vector<2x32xf32>
    %111 = arith.mulf %104, %110 : vector<2x32xf32>
    %c0_44 = arith.constant 0 : index
    %c0_45 = arith.constant 0 : index
    %112 = vector.load %arg6[%c0_44, %c0_45] : memref<2x32xf32, #tpu.memory_space<vmem>>, vector<2x32xf32>
    tpu.vector_store %arg6[%c0_44, %c0_45], %109 {strides = array<i32>} : memref<2x32xf32, #tpu.memory_space<vmem>>, vector<2x32xf32>,
    %c0_46 = arith.constant 0 : index
    %c0_47 = arith.constant 0 : index
    %113 = vector.load %arg5[%c0_46, %c0_47] : memref<2x32xf32, #tpu.memory_space<vmem>>, vector<2x32xf32>
    tpu.vector_store %arg5[%c0_46, %c0_47], %111 {strides = array<i32>} : memref<2x32xf32, #tpu.memory_space<vmem>>, vector<2x32xf32>,
    %114 = arith.index_cast %c2_i32 : i32 to index
    %c0_48 = arith.constant 0 : index
    %c0_49 = arith.constant 0 : index
    %115 = vector.load %arg3[%114, %c0_48, %c0_49] : memref<8x2x32xf32, #tpu.memory_space<vmem>>, vector<1x2x32xf32>
    %116 = vector.shape_cast %115 : vector<1x2x32xf32> to vector<2x32xf32>
    %117 = vector.shape_cast %111 : vector<2x32xf32> to vector<1x2x32xf32>
    tpu.vector_store %arg3[%114, %c0_48, %c0_49], %117 {strides = array<i32>} : memref<8x2x32xf32, #tpu.memory_space<vmem>>, vector<1x2x32xf32>,
    %c3_i32 = arith.constant 3 : i32
    %c0_50 = arith.constant 0 : index
    %c0_51 = arith.constant 0 : index
    %118 = vector.load %arg5[%c0_50, %c0_51] : memref<2x32xf32, #tpu.memory_space<vmem>>, vector<2x32xf32>
    %c0_52 = arith.constant 0 : index
    %c0_53 = arith.constant 0 : index
    %119 = vector.load %arg6[%c0_52, %c0_53] : memref<2x32xf32, #tpu.memory_space<vmem>>, vector<2x32xf32>
    %120 = arith.index_cast %c3_i32 : i32 to index
    %c0_54 = arith.constant 0 : index
    %c0_55 = arith.constant 0 : index
    %121 = vector.load %arg1[%120, %c0_54, %c0_55] : memref<8x2x128xf32, #tpu.memory_space<vmem>>, vector<1x2x128xf32>
    %122 = vector.shape_cast %121 : vector<1x2x128xf32> to vector<2x128xf32>
    %cst_56 = arith.constant dense<0.000000e+00> : vector<2x128xf32>
    %123 = tpu.matmul %118, %3, %cst_56 {dimension_numbers = #tpu.dot_dimension_numbers<[1], [0], [0], [1], [0, 0, 1, 1], [], []>} : vector<2x32xf32>, vector<32x128xf32>, vector<2x128xf32> -> vector<2x128xf32>
    %124 = arith.addf %122, %123 : vector<2x128xf32>
    %125 = vector.extract_strided_slice %124 {offsets = [0, 0], sizes = [2, 32], strides = [1, 1]} : vector<2x128xf32> to vector<2x32xf32>
    %126 = arith.negf %125 : vector<2x32xf32>
    %127 = math.exp %126 : vector<2x32xf32>
    %cst_57 = arith.constant 1.000000e+00 : f32
    %128 = vector.broadcast %cst_57 : f32 to vector<2x32xf32>
    %129 = arith.addf %128, %127 : vector<2x32xf32>
    %130 = arith.divf %128, %129 : vector<2x32xf32>
    %131 = vector.extract_strided_slice %124 {offsets = [0, 32], sizes = [2, 32], strides = [1, 1]} : vector<2x128xf32> to vector<2x32xf32>
    %132 = arith.negf %131 : vector<2x32xf32>
    %133 = math.exp %132 : vector<2x32xf32>
    %cst_58 = arith.constant 1.000000e+00 : f32
    %134 = vector.broadcast %cst_58 : f32 to vector<2x32xf32>
    %135 = arith.addf %134, %133 : vector<2x32xf32>
    %136 = arith.divf %134, %135 : vector<2x32xf32>
    %137 = vector.extract_strided_slice %124 {offsets = [0, 64], sizes = [2, 32], strides = [1, 1]} : vector<2x128xf32> to vector<2x32xf32>
    %138 = arith.negf %137 : vector<2x32xf32>
    %139 = math.exp %138 : vector<2x32xf32>
    %cst_59 = arith.constant 1.000000e+00 : f32
    %140 = vector.broadcast %cst_59 : f32 to vector<2x32xf32>
    %141 = arith.addf %140, %139 : vector<2x32xf32>
    %142 = arith.divf %140, %141 : vector<2x32xf32>
    %143 = vector.extract_strided_slice %124 {offsets = [0, 96], sizes = [2, 32], strides = [1, 1]} : vector<2x128xf32> to vector<2x32xf32>
    %144 = math.tanh %143 : vector<2x32xf32>
    %145 = arith.mulf %136, %119 : vector<2x32xf32>
    %146 = arith.mulf %130, %144 : vector<2x32xf32>
    %147 = arith.addf %145, %146 : vector<2x32xf32>
    %148 = math.tanh %147 : vector<2x32xf32>
    %149 = arith.mulf %142, %148 : vector<2x32xf32>
    %c0_60 = arith.constant 0 : index
    %c0_61 = arith.constant 0 : index
    %150 = vector.load %arg6[%c0_60, %c0_61] : memref<2x32xf32, #tpu.memory_space<vmem>>, vector<2x32xf32>
    tpu.vector_store %arg6[%c0_60, %c0_61], %147 {strides = array<i32>} : memref<2x32xf32, #tpu.memory_space<vmem>>, vector<2x32xf32>,
    %c0_62 = arith.constant 0 : index
    %c0_63 = arith.constant 0 : index
    %151 = vector.load %arg5[%c0_62, %c0_63] : memref<2x32xf32, #tpu.memory_space<vmem>>, vector<2x32xf32>
    tpu.vector_store %arg5[%c0_62, %c0_63], %149 {strides = array<i32>} : memref<2x32xf32, #tpu.memory_space<vmem>>, vector<2x32xf32>,
    %152 = arith.index_cast %c3_i32 : i32 to index
    %c0_64 = arith.constant 0 : index
    %c0_65 = arith.constant 0 : index
    %153 = vector.load %arg3[%152, %c0_64, %c0_65] : memref<8x2x32xf32, #tpu.memory_space<vmem>>, vector<1x2x32xf32>
    %154 = vector.shape_cast %153 : vector<1x2x32xf32> to vector<2x32xf32>
    %155 = vector.shape_cast %149 : vector<2x32xf32> to vector<1x2x32xf32>
    tpu.vector_store %arg3[%152, %c0_64, %c0_65], %155 {strides = array<i32>} : memref<8x2x32xf32, #tpu.memory_space<vmem>>, vector<1x2x32xf32>,
    %c4_i32 = arith.constant 4 : i32
    %c0_66 = arith.constant 0 : index
    %c0_67 = arith.constant 0 : index
    %156 = vector.load %arg5[%c0_66, %c0_67] : memref<2x32xf32, #tpu.memory_space<vmem>>, vector<2x32xf32>
    %c0_68 = arith.constant 0 : index
    %c0_69 = arith.constant 0 : index
    %157 = vector.load %arg6[%c0_68, %c0_69] : memref<2x32xf32, #tpu.memory_space<vmem>>, vector<2x32xf32>
    %158 = arith.index_cast %c4_i32 : i32 to index
    %c0_70 = arith.constant 0 : index
    %c0_71 = arith.constant 0 : index
    %159 = vector.load %arg1[%158, %c0_70, %c0_71] : memref<8x2x128xf32, #tpu.memory_space<vmem>>, vector<1x2x128xf32>
    %160 = vector.shape_cast %159 : vector<1x2x128xf32> to vector<2x128xf32>
    %cst_72 = arith.constant dense<0.000000e+00> : vector<2x128xf32>
    %161 = tpu.matmul %156, %3, %cst_72 {dimension_numbers = #tpu.dot_dimension_numbers<[1], [0], [0], [1], [0, 0, 1, 1], [], []>} : vector<2x32xf32>, vector<32x128xf32>, vector<2x128xf32> -> vector<2x128xf32>
    %162 = arith.addf %160, %161 : vector<2x128xf32>
    %163 = vector.extract_strided_slice %162 {offsets = [0, 0], sizes = [2, 32], strides = [1, 1]} : vector<2x128xf32> to vector<2x32xf32>
    %164 = arith.negf %163 : vector<2x32xf32>
    %165 = math.exp %164 : vector<2x32xf32>
    %cst_73 = arith.constant 1.000000e+00 : f32
    %166 = vector.broadcast %cst_73 : f32 to vector<2x32xf32>
    %167 = arith.addf %166, %165 : vector<2x32xf32>
    %168 = arith.divf %166, %167 : vector<2x32xf32>
    %169 = vector.extract_strided_slice %162 {offsets = [0, 32], sizes = [2, 32], strides = [1, 1]} : vector<2x128xf32> to vector<2x32xf32>
    %170 = arith.negf %169 : vector<2x32xf32>
    %171 = math.exp %170 : vector<2x32xf32>
    %cst_74 = arith.constant 1.000000e+00 : f32
    %172 = vector.broadcast %cst_74 : f32 to vector<2x32xf32>
    %173 = arith.addf %172, %171 : vector<2x32xf32>
    %174 = arith.divf %172, %173 : vector<2x32xf32>
    %175 = vector.extract_strided_slice %162 {offsets = [0, 64], sizes = [2, 32], strides = [1, 1]} : vector<2x128xf32> to vector<2x32xf32>
    %176 = arith.negf %175 : vector<2x32xf32>
    %177 = math.exp %176 : vector<2x32xf32>
    %cst_75 = arith.constant 1.000000e+00 : f32
    %178 = vector.broadcast %cst_75 : f32 to vector<2x32xf32>
    %179 = arith.addf %178, %177 : vector<2x32xf32>
    %180 = arith.divf %178, %179 : vector<2x32xf32>
    %181 = vector.extract_strided_slice %162 {offsets = [0, 96], sizes = [2, 32], strides = [1, 1]} : vector<2x128xf32> to vector<2x32xf32>
    %182 = math.tanh %181 : vector<2x32xf32>
    %183 = arith.mulf %174, %157 : vector<2x32xf32>
    %184 = arith.mulf %168, %182 : vector<2x32xf32>
    %185 = arith.addf %183, %184 : vector<2x32xf32>
    %186 = math.tanh %185 : vector<2x32xf32>
    %187 = arith.mulf %180, %186 : vector<2x32xf32>
    %c0_76 = arith.constant 0 : index
    %c0_77 = arith.constant 0 : index
    %188 = vector.load %arg6[%c0_76, %c0_77] : memref<2x32xf32, #tpu.memory_space<vmem>>, vector<2x32xf32>
    tpu.vector_store %arg6[%c0_76, %c0_77], %185 {strides = array<i32>} : memref<2x32xf32, #tpu.memory_space<vmem>>, vector<2x32xf32>,
    %c0_78 = arith.constant 0 : index
    %c0_79 = arith.constant 0 : index
    %189 = vector.load %arg5[%c0_78, %c0_79] : memref<2x32xf32, #tpu.memory_space<vmem>>, vector<2x32xf32>
    tpu.vector_store %arg5[%c0_78, %c0_79], %187 {strides = array<i32>} : memref<2x32xf32, #tpu.memory_space<vmem>>, vector<2x32xf32>,
    %190 = arith.index_cast %c4_i32 : i32 to index
    %c0_80 = arith.constant 0 : index
    %c0_81 = arith.constant 0 : index
    %191 = vector.load %arg3[%190, %c0_80, %c0_81] : memref<8x2x32xf32, #tpu.memory_space<vmem>>, vector<1x2x32xf32>
    %192 = vector.shape_cast %191 : vector<1x2x32xf32> to vector<2x32xf32>
    %193 = vector.shape_cast %187 : vector<2x32xf32> to vector<1x2x32xf32>
    tpu.vector_store %arg3[%190, %c0_80, %c0_81], %193 {strides = array<i32>} : memref<8x2x32xf32, #tpu.memory_space<vmem>>, vector<1x2x32xf32>,
    %c5_i32 = arith.constant 5 : i32
    %c0_82 = arith.constant 0 : index
    %c0_83 = arith.constant 0 : index
    %194 = vector.load %arg5[%c0_82, %c0_83] : memref<2x32xf32, #tpu.memory_space<vmem>>, vector<2x32xf32>
    %c0_84 = arith.constant 0 : index
    %c0_85 = arith.constant 0 : index
    %195 = vector.load %arg6[%c0_84, %c0_85] : memref<2x32xf32, #tpu.memory_space<vmem>>, vector<2x32xf32>
    %196 = arith.index_cast %c5_i32 : i32 to index
    %c0_86 = arith.constant 0 : index
    %c0_87 = arith.constant 0 : index
    %197 = vector.load %arg1[%196, %c0_86, %c0_87] : memref<8x2x128xf32, #tpu.memory_space<vmem>>, vector<1x2x128xf32>
    %198 = vector.shape_cast %197 : vector<1x2x128xf32> to vector<2x128xf32>
    %cst_88 = arith.constant dense<0.000000e+00> : vector<2x128xf32>
    %199 = tpu.matmul %194, %3, %cst_88 {dimension_numbers = #tpu.dot_dimension_numbers<[1], [0], [0], [1], [0, 0, 1, 1], [], []>} : vector<2x32xf32>, vector<32x128xf32>, vector<2x128xf32> -> vector<2x128xf32>
    %200 = arith.addf %198, %199 : vector<2x128xf32>
    %201 = vector.extract_strided_slice %200 {offsets = [0, 0], sizes = [2, 32], strides = [1, 1]} : vector<2x128xf32> to vector<2x32xf32>
    %202 = arith.negf %201 : vector<2x32xf32>
    %203 = math.exp %202 : vector<2x32xf32>
    %cst_89 = arith.constant 1.000000e+00 : f32
    %204 = vector.broadcast %cst_89 : f32 to vector<2x32xf32>
    %205 = arith.addf %204, %203 : vector<2x32xf32>
    %206 = arith.divf %204, %205 : vector<2x32xf32>
    %207 = vector.extract_strided_slice %200 {offsets = [0, 32], sizes = [2, 32], strides = [1, 1]} : vector<2x128xf32> to vector<2x32xf32>
    %208 = arith.negf %207 : vector<2x32xf32>
    %209 = math.exp %208 : vector<2x32xf32>
    %cst_90 = arith.constant 1.000000e+00 : f32
    %210 = vector.broadcast %cst_90 : f32 to vector<2x32xf32>
    %211 = arith.addf %210, %209 : vector<2x32xf32>
    %212 = arith.divf %210, %211 : vector<2x32xf32>
    %213 = vector.extract_strided_slice %200 {offsets = [0, 64], sizes = [2, 32], strides = [1, 1]} : vector<2x128xf32> to vector<2x32xf32>
    %214 = arith.negf %213 : vector<2x32xf32>
    %215 = math.exp %214 : vector<2x32xf32>
    %cst_91 = arith.constant 1.000000e+00 : f32
    %216 = vector.broadcast %cst_91 : f32 to vector<2x32xf32>
    %217 = arith.addf %216, %215 : vector<2x32xf32>
    %218 = arith.divf %216, %217 : vector<2x32xf32>
    %219 = vector.extract_strided_slice %200 {offsets = [0, 96], sizes = [2, 32], strides = [1, 1]} : vector<2x128xf32> to vector<2x32xf32>
    %220 = math.tanh %219 : vector<2x32xf32>
    %221 = arith.mulf %212, %195 : vector<2x32xf32>
    %222 = arith.mulf %206, %220 : vector<2x32xf32>
    %223 = arith.addf %221, %222 : vector<2x32xf32>
    %224 = math.tanh %223 : vector<2x32xf32>
    %225 = arith.mulf %218, %224 : vector<2x32xf32>
    %c0_92 = arith.constant 0 : index
    %c0_93 = arith.constant 0 : index
    %226 = vector.load %arg6[%c0_92, %c0_93] : memref<2x32xf32, #tpu.memory_space<vmem>>, vector<2x32xf32>
    tpu.vector_store %arg6[%c0_92, %c0_93], %223 {strides = array<i32>} : memref<2x32xf32, #tpu.memory_space<vmem>>, vector<2x32xf32>,
    %c0_94 = arith.constant 0 : index
    %c0_95 = arith.constant 0 : index
    %227 = vector.load %arg5[%c0_94, %c0_95] : memref<2x32xf32, #tpu.memory_space<vmem>>, vector<2x32xf32>
    tpu.vector_store %arg5[%c0_94, %c0_95], %225 {strides = array<i32>} : memref<2x32xf32, #tpu.memory_space<vmem>>, vector<2x32xf32>,
    %228 = arith.index_cast %c5_i32 : i32 to index
    %c0_96 = arith.constant 0 : index
    %c0_97 = arith.constant 0 : index
    %229 = vector.load %arg3[%228, %c0_96, %c0_97] : memref<8x2x32xf32, #tpu.memory_space<vmem>>, vector<1x2x32xf32>
    %230 = vector.shape_cast %229 : vector<1x2x32xf32> to vector<2x32xf32>
    %231 = vector.shape_cast %225 : vector<2x32xf32> to vector<1x2x32xf32>
    tpu.vector_store %arg3[%228, %c0_96, %c0_97], %231 {strides = array<i32>} : memref<8x2x32xf32, #tpu.memory_space<vmem>>, vector<1x2x32xf32>,
    %c6_i32 = arith.constant 6 : i32
    %c0_98 = arith.constant 0 : index
    %c0_99 = arith.constant 0 : index
    %232 = vector.load %arg5[%c0_98, %c0_99] : memref<2x32xf32, #tpu.memory_space<vmem>>, vector<2x32xf32>
    %c0_100 = arith.constant 0 : index
    %c0_101 = arith.constant 0 : index
    %233 = vector.load %arg6[%c0_100, %c0_101] : memref<2x32xf32, #tpu.memory_space<vmem>>, vector<2x32xf32>
    %234 = arith.index_cast %c6_i32 : i32 to index
    %c0_102 = arith.constant 0 : index
    %c0_103 = arith.constant 0 : index
    %235 = vector.load %arg1[%234, %c0_102, %c0_103] : memref<8x2x128xf32, #tpu.memory_space<vmem>>, vector<1x2x128xf32>
    %236 = vector.shape_cast %235 : vector<1x2x128xf32> to vector<2x128xf32>
    %cst_104 = arith.constant dense<0.000000e+00> : vector<2x128xf32>
    %237 = tpu.matmul %232, %3, %cst_104 {dimension_numbers = #tpu.dot_dimension_numbers<[1], [0], [0], [1], [0, 0, 1, 1], [], []>} : vector<2x32xf32>, vector<32x128xf32>, vector<2x128xf32> -> vector<2x128xf32>
    %238 = arith.addf %236, %237 : vector<2x128xf32>
    %239 = vector.extract_strided_slice %238 {offsets = [0, 0], sizes = [2, 32], strides = [1, 1]} : vector<2x128xf32> to vector<2x32xf32>
    %240 = arith.negf %239 : vector<2x32xf32>
    %241 = math.exp %240 : vector<2x32xf32>
    %cst_105 = arith.constant 1.000000e+00 : f32
    %242 = vector.broadcast %cst_105 : f32 to vector<2x32xf32>
    %243 = arith.addf %242, %241 : vector<2x32xf32>
    %244 = arith.divf %242, %243 : vector<2x32xf32>
    %245 = vector.extract_strided_slice %238 {offsets = [0, 32], sizes = [2, 32], strides = [1, 1]} : vector<2x128xf32> to vector<2x32xf32>
    %246 = arith.negf %245 : vector<2x32xf32>
    %247 = math.exp %246 : vector<2x32xf32>
    %cst_106 = arith.constant 1.000000e+00 : f32
    %248 = vector.broadcast %cst_106 : f32 to vector<2x32xf32>
    %249 = arith.addf %248, %247 : vector<2x32xf32>
    %250 = arith.divf %248, %249 : vector<2x32xf32>
    %251 = vector.extract_strided_slice %238 {offsets = [0, 64], sizes = [2, 32], strides = [1, 1]} : vector<2x128xf32> to vector<2x32xf32>
    %252 = arith.negf %251 : vector<2x32xf32>
    %253 = math.exp %252 : vector<2x32xf32>
    %cst_107 = arith.constant 1.000000e+00 : f32
    %254 = vector.broadcast %cst_107 : f32 to vector<2x32xf32>
    %255 = arith.addf %254, %253 : vector<2x32xf32>
    %256 = arith.divf %254, %255 : vector<2x32xf32>
    %257 = vector.extract_strided_slice %238 {offsets = [0, 96], sizes = [2, 32], strides = [1, 1]} : vector<2x128xf32> to vector<2x32xf32>
    %258 = math.tanh %257 : vector<2x32xf32>
    %259 = arith.mulf %250, %233 : vector<2x32xf32>
    %260 = arith.mulf %244, %258 : vector<2x32xf32>
    %261 = arith.addf %259, %260 : vector<2x32xf32>
    %262 = math.tanh %261 : vector<2x32xf32>
    %263 = arith.mulf %256, %262 : vector<2x32xf32>
    %c0_108 = arith.constant 0 : index
    %c0_109 = arith.constant 0 : index
    %264 = vector.load %arg6[%c0_108, %c0_109] : memref<2x32xf32, #tpu.memory_space<vmem>>, vector<2x32xf32>
    tpu.vector_store %arg6[%c0_108, %c0_109], %261 {strides = array<i32>} : memref<2x32xf32, #tpu.memory_space<vmem>>, vector<2x32xf32>,
    %c0_110 = arith.constant 0 : index
    %c0_111 = arith.constant 0 : index
    %265 = vector.load %arg5[%c0_110, %c0_111] : memref<2x32xf32, #tpu.memory_space<vmem>>, vector<2x32xf32>
    tpu.vector_store %arg5[%c0_110, %c0_111], %263 {strides = array<i32>} : memref<2x32xf32, #tpu.memory_space<vmem>>, vector<2x32xf32>,
    %266 = arith.index_cast %c6_i32 : i32 to index
    %c0_112 = arith.constant 0 : index
    %c0_113 = arith.constant 0 : index
    %267 = vector.load %arg3[%266, %c0_112, %c0_113] : memref<8x2x32xf32, #tpu.memory_space<vmem>>, vector<1x2x32xf32>
    %268 = vector.shape_cast %267 : vector<1x2x32xf32> to vector<2x32xf32>
    %269 = vector.shape_cast %263 : vector<2x32xf32> to vector<1x2x32xf32>
    tpu.vector_store %arg3[%266, %c0_112, %c0_113], %269 {strides = array<i32>} : memref<8x2x32xf32, #tpu.memory_space<vmem>>, vector<1x2x32xf32>,
    %c7_i32 = arith.constant 7 : i32
    %c0_114 = arith.constant 0 : index
    %c0_115 = arith.constant 0 : index
    %270 = vector.load %arg5[%c0_114, %c0_115] : memref<2x32xf32, #tpu.memory_space<vmem>>, vector<2x32xf32>
    %c0_116 = arith.constant 0 : index
    %c0_117 = arith.constant 0 : index
    %271 = vector.load %arg6[%c0_116, %c0_117] : memref<2x32xf32, #tpu.memory_space<vmem>>, vector<2x32xf32>
    %272 = arith.index_cast %c7_i32 : i32 to index
    %c0_118 = arith.constant 0 : index
    %c0_119 = arith.constant 0 : index
    %273 = vector.load %arg1[%272, %c0_118, %c0_119] : memref<8x2x128xf32, #tpu.memory_space<vmem>>, vector<1x2x128xf32>
    %274 = vector.shape_cast %273 : vector<1x2x128xf32> to vector<2x128xf32>
    %cst_120 = arith.constant dense<0.000000e+00> : vector<2x128xf32>
    %275 = tpu.matmul %270, %3, %cst_120 {dimension_numbers = #tpu.dot_dimension_numbers<[1], [0], [0], [1], [0, 0, 1, 1], [], []>} : vector<2x32xf32>, vector<32x128xf32>, vector<2x128xf32> -> vector<2x128xf32>
    %276 = arith.addf %274, %275 : vector<2x128xf32>
    %277 = vector.extract_strided_slice %276 {offsets = [0, 0], sizes = [2, 32], strides = [1, 1]} : vector<2x128xf32> to vector<2x32xf32>
    %278 = arith.negf %277 : vector<2x32xf32>
    %279 = math.exp %278 : vector<2x32xf32>
    %cst_121 = arith.constant 1.000000e+00 : f32
    %280 = vector.broadcast %cst_121 : f32 to vector<2x32xf32>
    %281 = arith.addf %280, %279 : vector<2x32xf32>
    %282 = arith.divf %280, %281 : vector<2x32xf32>
    %283 = vector.extract_strided_slice %276 {offsets = [0, 32], sizes = [2, 32], strides = [1, 1]} : vector<2x128xf32> to vector<2x32xf32>
    %284 = arith.negf %283 : vector<2x32xf32>
    %285 = math.exp %284 : vector<2x32xf32>
    %cst_122 = arith.constant 1.000000e+00 : f32
    %286 = vector.broadcast %cst_122 : f32 to vector<2x32xf32>
    %287 = arith.addf %286, %285 : vector<2x32xf32>
    %288 = arith.divf %286, %287 : vector<2x32xf32>
    %289 = vector.extract_strided_slice %276 {offsets = [0, 64], sizes = [2, 32], strides = [1, 1]} : vector<2x128xf32> to vector<2x32xf32>
    %290 = arith.negf %289 : vector<2x32xf32>
    %291 = math.exp %290 : vector<2x32xf32>
    %cst_123 = arith.constant 1.000000e+00 : f32
    %292 = vector.broadcast %cst_123 : f32 to vector<2x32xf32>
    %293 = arith.addf %292, %291 : vector<2x32xf32>
    %294 = arith.divf %292, %293 : vector<2x32xf32>
    %295 = vector.extract_strided_slice %276 {offsets = [0, 96], sizes = [2, 32], strides = [1, 1]} : vector<2x128xf32> to vector<2x32xf32>
    %296 = math.tanh %295 : vector<2x32xf32>
    %297 = arith.mulf %288, %271 : vector<2x32xf32>
    %298 = arith.mulf %282, %296 : vector<2x32xf32>
    %299 = arith.addf %297, %298 : vector<2x32xf32>
    %300 = math.tanh %299 : vector<2x32xf32>
    %301 = arith.mulf %294, %300 : vector<2x32xf32>
    %c0_124 = arith.constant 0 : index
    %c0_125 = arith.constant 0 : index
    %302 = vector.load %arg6[%c0_124, %c0_125] : memref<2x32xf32, #tpu.memory_space<vmem>>, vector<2x32xf32>
    tpu.vector_store %arg6[%c0_124, %c0_125], %299 {strides = array<i32>} : memref<2x32xf32, #tpu.memory_space<vmem>>, vector<2x32xf32>,
    %c0_126 = arith.constant 0 : index
    %c0_127 = arith.constant 0 : index
    %303 = vector.load %arg5[%c0_126, %c0_127] : memref<2x32xf32, #tpu.memory_space<vmem>>, vector<2x32xf32>
    tpu.vector_store %arg5[%c0_126, %c0_127], %301 {strides = array<i32>} : memref<2x32xf32, #tpu.memory_space<vmem>>, vector<2x32xf32>,
    %304 = arith.index_cast %c7_i32 : i32 to index
    %c0_128 = arith.constant 0 : index
    %c0_129 = arith.constant 0 : index
    %305 = vector.load %arg3[%304, %c0_128, %c0_129] : memref<8x2x32xf32, #tpu.memory_space<vmem>>, vector<1x2x32xf32>
    %306 = vector.shape_cast %305 : vector<1x2x32xf32> to vector<2x32xf32>
    %307 = vector.shape_cast %301 : vector<2x32xf32> to vector<1x2x32xf32>
    tpu.vector_store %arg3[%304, %c0_128, %c0_129], %307 {strides = array<i32>} : memref<8x2x32xf32, #tpu.memory_space<vmem>>, vector<1x2x32xf32>,
    %c8_i32 = arith.constant 8 : i32
    %c0_i32_130 = arith.constant 0 : i32
    %308 = arith.cmpi eq, %arg0, %c0_i32_130 : i32
    %309 = arith.extui %308 : i1 to i32
    %c0_i32_131 = arith.constant 0 : i32
    %310 = arith.cmpi ne, %309, %c0_i32_131 : i32
    scf.if %310 {
      %c0_132 = arith.constant 0 : index
      %c0_133 = arith.constant 0 : index
      %311 = vector.load %arg6[%c0_132, %c0_133] : memref<2x32xf32, #tpu.memory_space<vmem>>, vector<2x32xf32>
      %c0_134 = arith.constant 0 : index
      %c0_135 = arith.constant 0 : index
      %312 = vector.load %arg4[%c0_134, %c0_135] : memref<2x32xf32, #tpu.memory_space<vmem>>, vector<2x32xf32>
      tpu.vector_store %arg4[%c0_134, %c0_135], %311 {strides = array<i32>} : memref<2x32xf32, #tpu.memory_space<vmem>>, vector<2x32xf32>,
    } else {
    }
    return
  }
  func.func @transform_0(%arg0: i32) -> (i32, i32, i32) {
    %c0_i32 = arith.constant 0 : i32
    %c0_i32_0 = arith.constant 0 : i32
    %c0_i32_1 = arith.constant 0 : i32
    return %arg0, %c0_i32, %c0_i32_0 : i32, i32, i32
  }
  func.func @transform_1(%arg0: i32) -> (i32, i32) {
    %c0_i32 = arith.constant 0 : i32
    %c0_i32_0 = arith.constant 0 : i32
    %c0_i32_1 = arith.constant 0 : i32
    return %c0_i32, %c0_i32_0 : i32, i32
  }
  func.func @transform_2(%arg0: i32) -> (i32, i32, i32) {
    %c0_i32 = arith.constant 0 : i32
    %c0_i32_0 = arith.constant 0 : i32
    %c0_i32_1 = arith.constant 0 : i32
    return %arg0, %c0_i32, %c0_i32_0 : i32, i32, i32
  }
  func.func @transform_3(%arg0: i32) -> (i32, i32) {
    %c0_i32 = arith.constant 0 : i32
    %c0_i32_0 = arith.constant 0 : i32
    %c0_i32_1 = arith.constant 0 : i32
    return %c0_i32, %c0_i32_0 : i32, i32
  }
}

</mosaic_0001>

<bundles_post_ra>
// kernel: lstm_forward.1
= control target key start
LH: loop header
LB: loop body
LE: loop exit
PB: predicated region body
PF: predicated region fallthrough
CT: control target
= control target key end

     0   :  { %vm18_vm0 = vcmask 254976   ;;  %v1242_v1 = vmov 0.0   ;;  %vm1243_vm1 = vmmov 0   ;;  %s1504_s0 = inlined_call_operand.vmem [shape: f32[8,2,128], index: 0, kind: input, shape index: {}]   ;;  %s1505_s1 = inlined_call_operand.vmem [shape: f32[32,128], index: 1, kind: input, shape index: {}]   ;;  %s1506_s2 = inlined_call_operand.vmem [shape: f32[8,2,32], index: 2, kind: output, shape index: {0}]   ;;  %s1507_s3 = inlined_call_operand.hbm [shape: f32[2,32], index: 3, kind: output, shape index: {1}]  }
   0x1   :  { %v1271_v0 = vld [vmem:[%s1505_s1 + $0x18] sm:$0xff]  ;;  %1062 = vmatprep.subr.mxu0 %v1242_v1  ;;  %v1277_v2 = vld [vmem:[%s1505_s1 + $0x10] sm:$0xff]  ;;  %1070 = vmatprep.mubr.msk.f32.mxu0 %vm1243_vm1, %v1242_v1  ;;  %19 = vst.msk [vmem:[#allocation2] sm:$0x3] %vm18_vm0, %v1242_v1  ;;  %20 = vst.msk [vmem:[#allocation3] sm:$0x3] %vm18_vm0, %v1242_v1 }
   0x2   :  { %9 = vsyncpa [#allocation5], 0  ;;  %1063 = vmatpush3.msra.mxu0 %v1271_v0  ;;  %1073 = vmatprep.subr.mxu1 %v1242_v1  ;;  %v1291_v3 = vld [vmem:[%s1505_s1 + $0x8] sm:$0xff]  ;;  %v1300_v4 = vld [vmem:[%s1505_s1] sm:$0xff]  ;;  %vm28_vm2 = vcmask 261120   ;;  %s1244_s21 = smov 32  }
   0x3   :  { %1064 = vmatprep.subr.mxu0 %v1242_v1  ;;  %1074 = vmatpush3.msra.mxu1 %v1271_v0  ;;  %v27_v6 = vld [vmem:[%s1504_s0] sm:$0x3]  ;;  %s1245_s22 = smov 96   ;;  %s1246_s23 = smov 64   ;;  %v994_v29 = vld [vmem:[%s1504_s0 + $0x2] sm:$0x3] }
   0x4   :  { %1065 = vmatpush3.msra.mxu0 %v1277_v2  ;;  %1075 = vmatprep.subr.mxu1 %v1242_v1  ;;  %v998_v51 = vld [vmem:[%s1504_s0 + $0x4] sm:$0x3] }
   0x5   :  { %1066 = vmatprep.subr.mxu0 %v1242_v1  ;;  %1076 = vmatpush3.msra.mxu1 %v1277_v2 }
   0x6   :  { %1067 = vmatpush3.msra.mxu0 %v1291_v3  ;;  %1077 = vmatprep.subr.mxu1 %v1242_v1 }
   0x7   :  { %1068 = vmatprep.subr.mxu0 %v1242_v1  ;;  %1078 = vmatpush3.msra.mxu1 %v1291_v3 }
   0x8   :  { %1069 = vmatpush3.msra.mxu0 %v1300_v4  ;;  %v25_v5 = vld [vmem:[#allocation2] sm:$0x3]  ;;  %1079 = vmatprep.subr.mxu1 %v1242_v1  ;;  %v26_v11 = vld [vmem:[#allocation3] sm:$0x3] }
   0x9   :  { %1071 = vmatmul.mubr.msk.f32.vlgmr.msra.gmra.mxu0 %vm28_vm2, %v25_v5  ;;  %1080 = vmatpush3.msra.mxu1 %v1300_v4 }
   0xa   :  { %1081 = vmatprep.mubr.msk.f32.mxu1 %vm1243_vm1, %v1242_v1  ;;  %1084 = vmatprep.subr.mxu0 %v1242_v1 }
   0xb   :  { %1085 = vmatpush3.msra.mxu0 %v1271_v0  ;;  %1092 = vmatprep.mubr.msk.f32.mxu0 %vm1243_vm1, %v1242_v1 }
   0xc   :  { %1086 = vmatprep.subr.mxu0 %v1242_v1  ;;  %1095 = vmatprep.subr.mxu1 %v1242_v1 }
   0xd   :  { %1087 = vmatpush3.msra.mxu0 %v1277_v2 }
   0xe   :  { %1088 = vmatprep.subr.mxu0 %v1242_v1 }
   0xf   :  { %1089 = vmatpush3.msra.mxu0 %v1291_v3 }
  0x10   :  { %1090 = vmatprep.subr.mxu0 %v1242_v1 }
  0x11   :  { %1091 = vmatpush3.msra.mxu0 %v1300_v4 }
  0x12   :  { %1106 = vmatprep.subr.mxu0 %v1242_v1 }
  0xc9   :  { %v98_v7 = vpop.f32.mrf.mxu0 }
  0xca   :  { %v102_v8 = vadd.f32 %v98_v7, %v27_v6 }
  0xcb   :  { %v1072_v9 = vpop.f32.mrf.mxu0 }
  0xcc   :  { %1156 = vtanh.f32 %v102_v8  ;;  %v993_v12 = vmul.f32 -1.442695, %v102_v8 }
  0xce   :  { %1158 = vpow2.f32 %v993_v12 }
  0xd9   :  { %v1157_v10 = vpop.eup %1156 }
  0xda   :  { %116 = vrot.lane.b32.xlu0 %v1157_v10, %s1244_s21 }
  0xdb   :  { %v1159_v13 = vpop.eup %1158 }
  0xdc   :  { %v106_v14 = vadd.f32 1.0, %v1159_v13 }
  0xde   :  { %111 = vrot.lane.b32.xlu0 %v26_v11, %s1244_s21  ;;  %1160 = vrcp.f32 %v106_v14  ;;  %v1002_v14 = vld [vmem:[%s1504_s0 + $0x6] sm:$0x3] }
  0xeb   :  { %v1161_v15 = vpop.eup %1160 }
 0x14c   :  { %v117_v16 = vpop.permute.xlu0 %116 }
 0x14d   :  { %v119_v17 = vmul.f32 %v1161_v15, %v117_v16 }
 0x14f   :  { %121 = vrot.lane.b32.xlu1 %v119_v17, %s1244_s21 }
 0x150   :  { %v112_v18 = vpop.permute.xlu0 %111 }
 0x151   :  { %v114_v19 = vmul.f32 %v1161_v15, %v112_v18 }
 0x1c1   :  { %v122_v20 = vpop.permute.xlu1 %121 }
 0x1c2   :  { %v124_v21 = vadd.f32 %v122_v20, %v114_v19 }
 0x1c4   :  { %1162 = vtanh.f32 %v124_v21 }
 0x1d1   :  { %v1163_v22 = vpop.eup %1162 }
 0x1d2   :  { %127 = vrot.lane.b32.xlu1 %v1163_v22, %s1244_s21 }
 0x1d6   :  { %132 = vrot.lane.b32.xlu1 %v124_v21, %s1245_s22 }
 0x244   :  { %v128_v23 = vpop.permute.xlu1 %127 }
 0x245   :  { %v130_v24 = vmul.f32 %v1161_v15, %v128_v23 }
 0x247   :  { %138 = vrot.lane.b32.xlu0 %v130_v24, %s1246_s23 }
 0x248   :  { %v133_v25 = vpop.permute.xlu1 %132 }
 0x249   :  { %136 = vst.msk [vmem:[#allocation3] sm:$0x3] %vm18_vm0, %v133_v25 }
 0x250   :  { %v144_v26 = vld [vmem:[#allocation3] sm:$0x3] }
 0x251   :  { %229 = vrot.lane.b32.xlu1 %v144_v26, %s1244_s21 }
 0x2b9   :  { %v139_v27 = vpop.permute.xlu0 %138 }
 0x2ba   :  { %141 = vst.msk [vmem:[#allocation2] sm:$0x3] %vm18_vm0, %v139_v27  ;;  %142 = vst.msk [vmem:[%s1506_s2] sm:$0x3] %vm18_vm0, %v139_v27 }
 0x2c1   :  { %v143_v28 = vld [vmem:[#allocation2] sm:$0x3] }
 0x2c2   :  { %1082 = vmatmul.mubr.msk.f32.vlgmr.msra.gmra.mxu1 %vm28_vm2, %v143_v28 }
 0x2c3   :  { %1096 = vmatpush3.msra.mxu1 %v1271_v0  ;;  %1103 = vmatprep.mubr.msk.f32.mxu1 %vm1243_vm1, %v1242_v1  ;;  %v230_v40 = vpop.permute.xlu1 %229 }
 0x2c4   :  { %1097 = vmatprep.subr.mxu1 %v1242_v1 }
 0x2c5   :  { %1098 = vmatpush3.msra.mxu1 %v1277_v2 }
 0x2c6   :  { %1099 = vmatprep.subr.mxu1 %v1242_v1 }
 0x2c7   :  { %1100 = vmatpush3.msra.mxu1 %v1291_v3 }
 0x2c8   :  { %1101 = vmatprep.subr.mxu1 %v1242_v1 }
 0x2c9   :  { %1102 = vmatpush3.msra.mxu1 %v1300_v4 }
 0x2ca   :  { %1117 = vmatprep.subr.mxu1 %v1242_v1 }
 0x382   :  { %v216_v30 = vpop.f32.mrf.mxu1 }
 0x383   :  { %v220_v31 = vadd.f32 %v994_v29, %v216_v30 }
 0x384   :  { %v1083_v32 = vpop.f32.mrf.mxu1 }
 0x385   :  { %1164 = vtanh.f32 %v220_v31  ;;  %v996_v34 = vmul.f32 -1.442695, %v220_v31 }
 0x387   :  { %1166 = vpow2.f32 %v996_v34 }
 0x392   :  { %v1165_v33 = vpop.eup %1164 }
 0x393   :  { %234 = vrot.lane.b32.xlu0 %v1165_v33, %s1244_s21 }
 0x394   :  { %v1167_v35 = vpop.eup %1166 }
 0x395   :  { %v224_v36 = vadd.f32 1.0, %v1167_v35 }
 0x397   :  { %1168 = vrcp.f32 %v224_v36  ;;  %v1006_v36 = vld [vmem:[%s1504_s0 + $0x8] sm:$0x3] }
 0x3a4   :  { %v1169_v37 = vpop.eup %1168 }
 0x3a5   :  { %v232_v41 = vmul.f32 %v1169_v37, %v230_v40 }
 0x405   :  { %v235_v38 = vpop.permute.xlu0 %234 }
 0x406   :  { %v237_v39 = vmul.f32 %v1169_v37, %v235_v38 }
 0x408   :  { %239 = vrot.lane.b32.xlu0 %v237_v39, %s1244_s21 }
 0x47a   :  { %v240_v42 = vpop.permute.xlu0 %239 }
 0x47b   :  { %v242_v43 = vadd.f32 %v240_v42, %v232_v41 }
 0x47d   :  { %1170 = vtanh.f32 %v242_v43 }
 0x48a   :  { %v1171_v44 = vpop.eup %1170 }
 0x48b   :  { %245 = vrot.lane.b32.xlu1 %v1171_v44, %s1244_s21 }
 0x48f   :  { %250 = vrot.lane.b32.xlu1 %v242_v43, %s1245_s22 }
 0x4fd   :  { %v246_v45 = vpop.permute.xlu1 %245 }
 0x4fe   :  { %v248_v46 = vmul.f32 %v1169_v37, %v246_v45 }
 0x500   :  { %255 = vrot.lane.b32.xlu0 %v248_v46, %s1246_s23 }
 0x501   :  { %v251_v47 = vpop.permute.xlu1 %250 }
 0x502   :  { %253 = vst.msk [vmem:[#allocation3] sm:$0x3] %vm18_vm0, %v251_v47 }
 0x509   :  { %v262_v48 = vld [vmem:[#allocation3] sm:$0x3] }
 0x50a   :  { %347 = vrot.lane.b32.xlu1 %v262_v48, %s1244_s21 }
 0x572   :  { %v256_v49 = vpop.permute.xlu0 %255 }
 0x573   :  { %258 = vst.msk [vmem:[#allocation2] sm:$0x3] %vm18_vm0, %v256_v49  ;;  %997 = vst.msk [vmem:[%s1506_s2 + $0x2] sm:$0x3] %vm18_vm0, %v256_v49 }
 0x57a   :  { %v261_v50 = vld [vmem:[#allocation2] sm:$0x3] }
 0x57b   :  { %1093 = vmatmul.mubr.msk.f32.vlgmr.msra.gmra.mxu0 %vm28_vm2, %v261_v50 }
 0x57c   :  { %1107 = vmatpush3.msra.mxu0 %v1271_v0  ;;  %1114 = vmatprep.mubr.msk.f32.mxu0 %vm1243_vm1, %v1242_v1  ;;  %v348_v62 = vpop.permute.xlu1 %347 }
 0x57d   :  { %1108 = vmatprep.subr.mxu0 %v1242_v1 }
 0x57e   :  { %1109 = vmatpush3.msra.mxu0 %v1277_v2 }
 0x57f   :  { %1110 = vmatprep.subr.mxu0 %v1242_v1 }
 0x580   :  { %1111 = vmatpush3.msra.mxu0 %v1291_v3 }
 0x581   :  { %1112 = vmatprep.subr.mxu0 %v1242_v1 }
 0x582   :  { %1113 = vmatpush3.msra.mxu0 %v1300_v4 }
 0x583   :  { %1128 = vmatprep.subr.mxu0 %v1242_v1 }
 0x63b   :  { %v334_v52 = vpop.f32.mrf.mxu0 }
 0x63c   :  { %v338_v53 = vadd.f32 %v998_v51, %v334_v52 }
 0x63d   :  { %v1094_v54 = vpop.f32.mrf.mxu0 }
 0x63e   :  { %1172 = vtanh.f32 %v338_v53  ;;  %v1000_v56 = vmul.f32 -1.442695, %v338_v53 }
 0x640   :  { %1174 = vpow2.f32 %v1000_v56 }
 0x64b   :  { %v1173_v55 = vpop.eup %1172 }
 0x64c   :  { %352 = vrot.lane.b32.xlu0 %v1173_v55, %s1244_s21 }
 0x64d   :  { %v1175_v57 = vpop.eup %1174 }
 0x64e   :  { %v342_v58 = vadd.f32 1.0, %v1175_v57 }
 0x650   :  { %1176 = vrcp.f32 %v342_v58  ;;  %v1010_v58 = vld [vmem:[%s1504_s0 + $0xa] sm:$0x3] }
 0x65d   :  { %v1177_v59 = vpop.eup %1176 }
 0x65e   :  { %v350_v63 = vmul.f32 %v1177_v59, %v348_v62 }
 0x6be   :  { %v353_v60 = vpop.permute.xlu0 %352 }
 0x6bf   :  { %v355_v61 = vmul.f32 %v1177_v59, %v353_v60 }
 0x6c1   :  { %357 = vrot.lane.b32.xlu0 %v355_v61, %s1244_s21 }
 0x733   :  { %v358_v5 = vpop.permute.xlu0 %357 }
 0x734   :  { %v360_v6 = vadd.f32 %v358_v5, %v350_v63 }
 0x736   :  { %1178 = vtanh.f32 %v360_v6 }
 0x743   :  { %v1179_v7 = vpop.eup %1178 }
 0x744   :  { %363 = vrot.lane.b32.xlu1 %v1179_v7, %s1244_s21 }
 0x748   :  { %368 = vrot.lane.b32.xlu1 %v360_v6, %s1245_s22 }
 0x7b6   :  { %v364_v8 = vpop.permute.xlu1 %363 }
 0x7b7   :  { %v366_v9 = vmul.f32 %v1177_v59, %v364_v8 }
 0x7b9   :  { %373 = vrot.lane.b32.xlu0 %v366_v9, %s1246_s23 }
 0x7ba   :  { %v369_v10 = vpop.permute.xlu1 %368 }
 0x7bb   :  { %371 = vst.msk [vmem:[#allocation3] sm:$0x3] %vm18_vm0, %v369_v10 }
 0x7c2   :  { %v380_v11 = vld [vmem:[#allocation3] sm:$0x3] }
 0x7c3   :  { %465 = vrot.lane.b32.xlu1 %v380_v11, %s1244_s21 }
 0x82b   :  { %v374_v12 = vpop.permute.xlu0 %373 }
 0x82c   :  { %376 = vst.msk [vmem:[#allocation2] sm:$0x3] %vm18_vm0, %v374_v12  ;;  %1001 = vst.msk [vmem:[%s1506_s2 + $0x4] sm:$0x3] %vm18_vm0, %v374_v12 }
 0x833   :  { %v379_v13 = vld [vmem:[#allocation2] sm:$0x3] }
 0x834   :  { %1104 = vmatmul.mubr.msk.f32.vlgmr.msra.gmra.mxu1 %vm28_vm2, %v379_v13 }
 0x835   :  { %1118 = vmatpush3.msra.mxu1 %v1271_v0  ;;  %1125 = vmatprep.mubr.msk.f32.mxu1 %vm1243_vm1, %v1242_v1  ;;  %v466_v25 = vpop.permute.xlu1 %465 }
 0x836   :  { %1119 = vmatprep.subr.mxu1 %v1242_v1 }
 0x837   :  { %1120 = vmatpush3.msra.mxu1 %v1277_v2 }
 0x838   :  { %1121 = vmatprep.subr.mxu1 %v1242_v1 }
 0x839   :  { %1122 = vmatpush3.msra.mxu1 %v1291_v3 }
 0x83a   :  { %1123 = vmatprep.subr.mxu1 %v1242_v1 }
 0x83b   :  { %1124 = vmatpush3.msra.mxu1 %v1300_v4 }
 0x83c   :  { %1139 = vmatprep.subr.mxu1 %v1242_v1 }
 0x8f4   :  { %v452_v15 = vpop.f32.mrf.mxu1 }
 0x8f5   :  { %v456_v16 = vadd.f32 %v1002_v14, %v452_v15 }
 0x8f6   :  { %v1105_v17 = vpop.f32.mrf.mxu1 }
 0x8f7   :  { %1180 = vtanh.f32 %v456_v16  ;;  %v1004_v19 = vmul.f32 -1.442695, %v456_v16  ;;  %v1014_v16 = vld [vmem:[%s1504_s0 + $0xc] sm:$0x3] }
 0x8f9   :  { %1182 = vpow2.f32 %v1004_v19 }
 0x904   :  { %v1181_v18 = vpop.eup %1180 }
 0x905   :  { %470 = vrot.lane.b32.xlu0 %v1181_v18, %s1244_s21 }
 0x906   :  { %v1183_v20 = vpop.eup %1182 }
 0x907   :  { %v460_v21 = vadd.f32 1.0, %v1183_v20 }
 0x909   :  { %1184 = vrcp.f32 %v460_v21 }
 0x916   :  { %v1185_v22 = vpop.eup %1184 }
 0x917   :  { %v468_v26 = vmul.f32 %v1185_v22, %v466_v25 }
 0x977   :  { %v471_v23 = vpop.permute.xlu0 %470 }
 0x978   :  { %v473_v24 = vmul.f32 %v1185_v22, %v471_v23 }
 0x97a   :  { %475 = vrot.lane.b32.xlu0 %v473_v24, %s1244_s21 }
 0x9ec   :  { %v476_v27 = vpop.permute.xlu0 %475 }
 0x9ed   :  { %v478_v28 = vadd.f32 %v476_v27, %v468_v26 }
 0x9ef   :  { %1186 = vtanh.f32 %v478_v28 }
 0x9fc   :  { %v1187_v29 = vpop.eup %1186 }
 0x9fd   :  { %481 = vrot.lane.b32.xlu1 %v1187_v29, %s1244_s21 }
 0xa01   :  { %486 = vrot.lane.b32.xlu1 %v478_v28, %s1245_s22 }
 0xa6f   :  { %v482_v30 = vpop.permute.xlu1 %481 }
 0xa70   :  { %v484_v31 = vmul.f32 %v1185_v22, %v482_v30 }
 0xa72   :  { %491 = vrot.lane.b32.xlu0 %v484_v31, %s1246_s23 }
 0xa73   :  { %v487_v32 = vpop.permute.xlu1 %486 }
 0xa74   :  { %489 = vst.msk [vmem:[#allocation3] sm:$0x3] %vm18_vm0, %v487_v32 }
 0xa7b   :  { %v498_v33 = vld [vmem:[#allocation3] sm:$0x3] }
 0xa7c   :  { %583 = vrot.lane.b32.xlu1 %v498_v33, %s1244_s21 }
 0xae4   :  { %v492_v34 = vpop.permute.xlu0 %491 }
 0xae5   :  { %494 = vst.msk [vmem:[#allocation2] sm:$0x3] %vm18_vm0, %v492_v34  ;;  %1005 = vst.msk [vmem:[%s1506_s2 + $0x6] sm:$0x3] %vm18_vm0, %v492_v34 }
 0xaec   :  { %v497_v35 = vld [vmem:[#allocation2] sm:$0x3] }
 0xaed   :  { %1115 = vmatmul.mubr.msk.f32.vlgmr.msra.gmra.mxu0 %vm28_vm2, %v497_v35 }
 0xaee   :  { %1129 = vmatpush3.msra.mxu0 %v1271_v0  ;;  %1136 = vmatprep.mubr.msk.f32.mxu0 %vm1243_vm1, %v1242_v1  ;;  %v584_v47 = vpop.permute.xlu1 %583 }
 0xaef   :  { %1130 = vmatprep.subr.mxu0 %v1242_v1 }
 0xaf0   :  { %1131 = vmatpush3.msra.mxu0 %v1277_v2 }
 0xaf1   :  { %1132 = vmatprep.subr.mxu0 %v1242_v1 }
 0xaf2   :  { %1133 = vmatpush3.msra.mxu0 %v1291_v3 }
 0xaf3   :  { %1134 = vmatprep.subr.mxu0 %v1242_v1 }
 0xaf4   :  { %1135 = vmatpush3.msra.mxu0 %v1300_v4 }
 0xbad   :  { %v570_v37 = vpop.f32.mrf.mxu0 }
 0xbae   :  { %v574_v38 = vadd.f32 %v1006_v36, %v570_v37 }
 0xbaf   :  { %v1116_v39 = vpop.f32.mrf.mxu0 }
 0xbb0   :  { %1188 = vtanh.f32 %v574_v38  ;;  %v1008_v41 = vmul.f32 -1.442695, %v574_v38  ;;  %v1018_v38 = vld [vmem:[%s1504_s0 + $0xe] sm:$0x3]  ;;  %s1247_s0 = smov [#allocation4]  }
 0xbb1   :  { %s982_s27 = sshll.u32 %s1247_s0, 4  ;;  %s983_s27 = int_to_ptr.vmem [resolvable:$true] %s982_s27 }
 0xbb2   :  { %1190 = vpow2.f32 %v1008_v41  ;;  %s1220_s28 = scalar_lea.vmem %s983_s27, 32  ;;  %p1225_p1 = scmp.lt.s32.totalorder %s983_s27, %s983_s27 }
 0xbb3   :  { %p1221_p0 = scmp.ne.s32.totalorder %s983_s27, %s1220_s28  ;;  %p1226_p2 = scmp.lt.s32.totalorder %s1220_s28, %s1220_s28 }
 0xbb5   :  { %p1227_p3 = por %p1226_p2, %p1225_p1 }
 0xbb7   :  { %p1228_p4 = pnand %p1227_p3, %p1221_p0 }
 0xbbd   :  { %v1189_v40 = vpop.eup %1188 }
 0xbbe   :  { %588 = vrot.lane.b32.xlu0 %v1189_v40, %s1244_s21 }
 0xbbf   :  { %v1191_v42 = vpop.eup %1190 }
 0xbc0   :  { %v578_v43 = vadd.f32 1.0, %v1191_v42 }
 0xbc2   :  { %1192 = vrcp.f32 %v578_v43 }
 0xbcf   :  { %v1193_v44 = vpop.eup %1192 }
 0xbd0   :  { %v586_v48 = vmul.f32 %v1193_v44, %v584_v47 }
 0xc30   :  { %v589_v45 = vpop.permute.xlu0 %588 }
 0xc31   :  { %v591_v46 = vmul.f32 %v1193_v44, %v589_v45 }
 0xc33   :  { %593 = vrot.lane.b32.xlu0 %v591_v46, %s1244_s21 }
 0xca5   :  { %v594_v49 = vpop.permute.xlu0 %593 }
 0xca6   :  { %v596_v50 = vadd.f32 %v594_v49, %v586_v48 }
 0xca8   :  { %1194 = vtanh.f32 %v596_v50 }
 0xcb5   :  { %v1195_v51 = vpop.eup %1194 }
 0xcb6   :  { %599 = vrot.lane.b32.xlu1 %v1195_v51, %s1244_s21 }
 0xcba   :  { %604 = vrot.lane.b32.xlu1 %v596_v50, %s1245_s22 }
 0xd28   :  { %v600_v52 = vpop.permute.xlu1 %599 }
 0xd29   :  { %v602_v53 = vmul.f32 %v1193_v44, %v600_v52 }
 0xd2b   :  { %609 = vrot.lane.b32.xlu0 %v602_v53, %s1246_s23 }
 0xd2c   :  { %v605_v54 = vpop.permute.xlu1 %604 }
 0xd2d   :  { %607 = vst.msk [vmem:[#allocation3] sm:$0x3] %vm18_vm0, %v605_v54 }
 0xd34   :  { %v616_v55 = vld [vmem:[#allocation3] sm:$0x3] }
 0xd35   :  { %701 = vrot.lane.b32.xlu1 %v616_v55, %s1244_s21 }
 0xd9d   :  { %v610_v56 = vpop.permute.xlu0 %609 }
 0xd9e   :  { %612 = vst.msk [vmem:[#allocation2] sm:$0x3] %vm18_vm0, %v610_v56  ;;  %1009 = vst.msk [vmem:[%s1506_s2 + $0x8] sm:$0x3] %vm18_vm0, %v610_v56 }
 0xda5   :  { %v615_v57 = vld [vmem:[#allocation2] sm:$0x3] }
 0xda6   :  { %1126 = vmatmul.mubr.msk.f32.vlgmr.msra.gmra.mxu1 %vm28_vm2, %v615_v57 }
 0xda7   :  { %1140 = vmatpush3.msra.mxu1 %v1271_v0  ;;  %1147 = vmatprep.mubr.msk.f32.mxu1 %vm1243_vm1, %v1242_v1 }
 0xda8   :  { %1141 = vmatprep.subr.mxu1 %v1242_v1 }
 0xda9   :  { %1142 = vmatpush3.msra.mxu1 %v1277_v2 }
 0xdaa   :  { %1143 = vmatprep.subr.mxu1 %v1242_v1 }
 0xdab   :  { %1144 = vmatpush3.msra.mxu1 %v1291_v3 }
 0xdac   :  { %1145 = vmatprep.subr.mxu1 %v1242_v1 }
 0xdad   :  { %1146 = vmatpush3.msra.mxu1 %v1300_v4  ;;  %v702_v4 = vpop.permute.xlu1 %701 }
 0xe66   :  { %v688_v0 = vpop.f32.mrf.mxu1 }
 0xe67   :  { %v692_v59 = vadd.f32 %v1010_v58, %v688_v0 }
 0xe68   :  { %v1127_v60 = vpop.f32.mrf.mxu1 }
 0xe69   :  { %1196 = vtanh.f32 %v692_v59  ;;  %v1012_v2 = vmul.f32 -1.442695, %v692_v59 }
 0xe6b   :  { %1198 = vpow2.f32 %v1012_v2 }
 0xe76   :  { %v1197_v61 = vpop.eup %1196 }
 0xe77   :  { %706 = vrot.lane.b32.xlu0 %v1197_v61, %s1244_s21 }
 0xe78   :  { %v1199_v62 = vpop.eup %1198 }
 0xe79   :  { %v696_v63 = vadd.f32 1.0, %v1199_v62 }
 0xe7b   :  { %1200 = vrcp.f32 %v696_v63 }
 0xe88   :  { %v1201_v3 = vpop.eup %1200 }
 0xe89   :  { %v704_v6 = vmul.f32 %v1201_v3, %v702_v4 }
 0xee9   :  { %v707_v1 = vpop.permute.xlu0 %706 }
 0xeea   :  { %v709_v5 = vmul.f32 %v1201_v3, %v707_v1 }
 0xeec   :  { %711 = vrot.lane.b32.xlu0 %v709_v5, %s1244_s21 }
 0xf5e   :  { %v712_v7 = vpop.permute.xlu0 %711 }
 0xf5f   :  { %v714_v8 = vadd.f32 %v712_v7, %v704_v6 }
 0xf61   :  { %1202 = vtanh.f32 %v714_v8 }
 0xf6e   :  { %v1203_v9 = vpop.eup %1202 }
 0xf6f   :  { %717 = vrot.lane.b32.xlu1 %v1203_v9, %s1244_s21 }
 0xf73   :  { %722 = vrot.lane.b32.xlu1 %v714_v8, %s1245_s22 }
 0xfe1   :  { %v718_v10 = vpop.permute.xlu1 %717 }
 0xfe2   :  { %v720_v11 = vmul.f32 %v1201_v3, %v718_v10 }
 0xfe4   :  { %727 = vrot.lane.b32.xlu0 %v720_v11, %s1246_s23 }
 0xfe5   :  { %v723_v12 = vpop.permute.xlu1 %722 }
 0xfe6   :  { %725 = vst.msk [vmem:[#allocation3] sm:$0x3] %vm18_vm0, %v723_v12 }
 0xfed   :  { %v734_v13 = vld [vmem:[#allocation3] sm:$0x3] }
 0xfee   :  { %819 = vrot.lane.b32.xlu1 %v734_v13, %s1244_s21 }
0x1056   :  { %v728_v14 = vpop.permute.xlu0 %727 }
0x1057   :  { %730 = vst.msk [vmem:[#allocation2] sm:$0x3] %vm18_vm0, %v728_v14  ;;  %1013 = vst.msk [vmem:[%s1506_s2 + $0xa] sm:$0x3] %vm18_vm0, %v728_v14 }
0x105e   :  { %v733_v15 = vld [vmem:[#allocation2] sm:$0x3] }
0x105f   :  { %1137 = vmatmul.mubr.msk.f32.vlgmr.msra.gmra.mxu0 %vm28_vm2, %v733_v15 }
0x1060   :  { %v820_v27 = vpop.permute.xlu1 %819 }
0x111f   :  { %v806_v17 = vpop.f32.mrf.mxu0 }
0x1120   :  { %v810_v18 = vadd.f32 %v1014_v16, %v806_v17 }
0x1121   :  { %v1138_v19 = vpop.f32.mrf.mxu0 }
0x1122   :  { %1204 = vtanh.f32 %v810_v18  ;;  %v1016_v21 = vmul.f32 -1.442695, %v810_v18 }
0x1124   :  { %1206 = vpow2.f32 %v1016_v21 }
0x112f   :  { %v1205_v20 = vpop.eup %1204 }
0x1130   :  { %824 = vrot.lane.b32.xlu0 %v1205_v20, %s1244_s21 }
0x1131   :  { %v1207_v22 = vpop.eup %1206 }
0x1132   :  { %v814_v23 = vadd.f32 1.0, %v1207_v22 }
0x1134   :  { %1208 = vrcp.f32 %v814_v23 }
0x1141   :  { %v1209_v24 = vpop.eup %1208 }
0x1142   :  { %v822_v28 = vmul.f32 %v1209_v24, %v820_v27 }
0x11a2   :  { %v825_v25 = vpop.permute.xlu0 %824 }
0x11a3   :  { %v827_v26 = vmul.f32 %v1209_v24, %v825_v25 }
0x11a5   :  { %829 = vrot.lane.b32.xlu0 %v827_v26, %s1244_s21 }
0x1217   :  { %v830_v29 = vpop.permute.xlu0 %829 }
0x1218   :  { %v832_v30 = vadd.f32 %v830_v29, %v822_v28 }
0x121a   :  { %1210 = vtanh.f32 %v832_v30 }
0x1227   :  { %v1211_v31 = vpop.eup %1210 }
0x1228   :  { %835 = vrot.lane.b32.xlu1 %v1211_v31, %s1244_s21 }
0x122c   :  { %840 = vrot.lane.b32.xlu1 %v832_v30, %s1245_s22 }
0x129a   :  { %v836_v32 = vpop.permute.xlu1 %835 }
0x129b   :  { %v838_v33 = vmul.f32 %v1209_v24, %v836_v32 }
0x129d   :  { %845 = vrot.lane.b32.xlu0 %v838_v33, %s1246_s23 }
0x129e   :  { %v841_v34 = vpop.permute.xlu1 %840 }
0x129f   :  { %843 = vst.msk [vmem:[#allocation3] sm:$0x3] %vm18_vm0, %v841_v34 }
0x12a6   :  { %v852_v35 = vld [vmem:[#allocation3] sm:$0x3] }
0x12a7   :  { %937 = vrot.lane.b32.xlu1 %v852_v35, %s1244_s21 }
0x130f   :  { %v846_v36 = vpop.permute.xlu0 %845 }
0x1310   :  { %848 = vst.msk [vmem:[#allocation2] sm:$0x3] %vm18_vm0, %v846_v36  ;;  %1017 = vst.msk [vmem:[%s1506_s2 + $0xc] sm:$0x3] %vm18_vm0, %v846_v36 }
0x1317   :  { %v851_v37 = vld [vmem:[#allocation2] sm:$0x3] }
0x1318   :  { %1148 = vmatmul.mubr.msk.f32.vlgmr.msra.gmra.mxu1 %vm28_vm2, %v851_v37 }
0x1319   :  { %v938_v49 = vpop.permute.xlu1 %937 }
0x13d8   :  { %v924_v39 = vpop.f32.mrf.mxu1 }
0x13d9   :  { %v928_v40 = vadd.f32 %v1018_v38, %v924_v39 }
0x13da   :  { %v1149_v41 = vpop.f32.mrf.mxu1 }
0x13db   :  { %1212 = vtanh.f32 %v928_v40  ;;  %v1020_v43 = vmul.f32 -1.442695, %v928_v40 }
0x13dd   :  { %1214 = vpow2.f32 %v1020_v43 }
0x13e8   :  { %v1213_v42 = vpop.eup %1212 }
0x13e9   :  { %942 = vrot.lane.b32.xlu0 %v1213_v42, %s1244_s21 }
0x13ea   :  { %v1215_v44 = vpop.eup %1214 }
0x13eb   :  { %v932_v45 = vadd.f32 1.0, %v1215_v44 }
0x13ed   :  { %1216 = vrcp.f32 %v932_v45 }
0x13fa   :  { %v1217_v46 = vpop.eup %1216 }
0x13fb   :  { %v940_v50 = vmul.f32 %v1217_v46, %v938_v49 }
0x145b   :  { %v943_v47 = vpop.permute.xlu0 %942 }
0x145c   :  { %v945_v48 = vmul.f32 %v1217_v46, %v943_v47 }
0x145e   :  { %947 = vrot.lane.b32.xlu0 %v945_v48, %s1244_s21 }
0x14d0   :  { %v948_v51 = vpop.permute.xlu0 %947 }
0x14d1   :  { %v950_v52 = vadd.f32 %v948_v51, %v940_v50 }
0x14d3   :  { %1218 = vtanh.f32 %v950_v52  ;;  %958 = vrot.lane.b32.xlu0 %v950_v52, %s1245_s22 }
0x14e0   :  { %v1219_v53 = vpop.eup %1218 }
0x14e1   :  { %953 = vrot.lane.b32.xlu1 %v1219_v53, %s1244_s21 }
0x1545   :  { %v959_v54 = vpop.permute.xlu0 %958 }
0x1546   :  { %961 = vst.msk [vmem:[#allocation3] sm:$0x3] %vm18_vm0, %v959_v54 }
0x154d   :  { %v972_v55 = vld [vmem:[#allocation3] sm:$0x3] }
0x154e   :  { %973 = vst.msk [vmem:[#allocation4] sm:$0x3] %vm18_vm0, %v972_v55 }
0x154f   :  { %1231 = shalt.err (!%p1228_p4)
}
0x1550   :  { %985 = dma.vmem_to_hbm [thread:$0]  %s983_s27, 32, %s1507_s3, [#allocation5]  }
0x1553   :  { %v954_v56 = vpop.permute.xlu1 %953 }
0x1554   :  { %v956_v57 = vmul.f32 %v1217_v46, %v954_v56 }
0x1556   :  { %963 = vrot.lane.b32.xlu1 %v956_v57, %s1246_s23 }
0x15c8   :  { %v964_v58 = vpop.permute.xlu1 %963 }
0x15c9   :  { %966 = vst.msk [vmem:[#allocation2] sm:$0x3] %vm18_vm0, %v964_v58  ;;  %1021 = vst.msk [vmem:[%s1506_s2 + $0xe] sm:$0x3] %vm18_vm0, %v964_v58 }
0x15ca   :  { %1240 = dma.done.wait [#allocation5], 32  }
0x15cb   :  { %1241 = vsyncadd [#allocation5], 4294967264 }
0x15cc   :  { %991 = vsyncpa [#allocation5], 1 }

</bundles_post_ra>
